<compile_context>
chip_gen: v6e
topology: v6e:2x2x1
jax: 0.10.0
libtpu: 0.0.40
codegen_flags: <defaults>
</compile_context>

<pallas_src>
import functools

import jax
import jax.numpy as jnp
from jax.experimental import pallas as pl
from jax.experimental.pallas import tpu as pltpu

N_ANN_LAYERS = 2  # exercise both fc0 and the fc/relu loop (PyTorch default is 1)


def _round_up(x, m):
    return ((x + m - 1) // m) * m


def _ann_kernel(x_ref, w0_ref, b0_ref, w_ref, b_ref, o_ref, *, n_layers):
    # fc0: (TM, K_in)bf16 @ (K_in, N)bf16 -> f32 accumulate, f32 bias add.
    h = jnp.dot(x_ref[...], w0_ref[...], preferred_element_type=jnp.float32)
    h = h + b0_ref[...]
    # repeated fc(dropout(relu(h))) -- dropout is identity in eval mode.
    for _ in range(n_layers - 1):
        h = jnp.maximum(h, 0.0).astype(w_ref.dtype)
        h = jnp.dot(h, w_ref[...], preferred_element_type=jnp.float32)
        h = h + b_ref[...]
    o_ref[...] = h.astype(o_ref.dtype)


def ann_forward(x, w0_t, b0, w_t, b, *, n_layers=N_ANN_LAYERS, tile_m=1024,
                compute_dtype=jnp.bfloat16):
    """x: (B, S, K_in) f32. w0_t: (K_in, N). w_t: (N, N). b0, b: (N,)."""
    B, S, K_in = x.shape
    N = w0_t.shape[1]
    M = B * S

    # Clamp the tile to the (16-aligned) problem size so tiny inputs don't
    # over-pad; for real workloads tile_m stays 512-2048 (VMEM cost is well
    # under the scoped default on v5e/v6e/v7x) and M >> tile_m keeps >=2
    # parallel steps for v7x's two TensorCores.
    tile_m = min(tile_m, _round_up(M, 16))
    M_pad = _round_up(M, tile_m)

    x2d = x.reshape(M, K_in).astype(compute_dtype)
    if M_pad != M:
        x2d = jnp.pad(x2d, ((0, M_pad - M), (0, 0)))

    w0c = w0_t.astype(compute_dtype)
    wc = w_t.astype(compute_dtype)
    b0_2d = b0.reshape(1, N).astype(jnp.float32)
    b_2d = b.reshape(1, N).astype(jnp.float32)

    kernel = functools.partial(_ann_kernel, n_layers=n_layers)

    out2d = pl.pallas_call(
        kernel,
        out_shape=jax.ShapeDtypeStruct((M_pad, N), jnp.float32),
        grid_spec=pltpu.PrefetchScalarGridSpec(
            num_scalar_prefetch=0,
            grid=(M_pad // tile_m,),
            in_specs=[
                pl.BlockSpec((tile_m, K_in), lambda i: (i, 0)),  # x row-tile
                pl.BlockSpec((K_in, N), lambda i: (0, 0)),       # W0^T (resident)
                pl.BlockSpec((1, N), lambda i: (0, 0)),          # b0   (resident)
                pl.BlockSpec((N, N), lambda i: (0, 0)),          # W^T  (resident)
                pl.BlockSpec((1, N), lambda i: (0, 0)),          # b    (resident)
            ],
            out_specs=pl.BlockSpec((tile_m, N), lambda i: (i, 0)),
        ),
        compiler_params=pltpu.CompilerParams(
            dimension_semantics=("parallel",)),
    )(x2d, w0c, b0_2d, wc, b_2d)

    return out2d[:M].reshape(B, S, N)


def reference_forward(x, w0_t, b0, w_t, b, *, n_layers=N_ANN_LAYERS,
                      compute_dtype=jnp.bfloat16):
    """Pure-JAX reference with the same bf16-operand / f32-accumulate recipe."""
    B, S, K = x.shape
    N = w0_t.shape[1]
    xc = x.reshape(-1, K).astype(compute_dtype)
    w0c = w0_t.astype(compute_dtype)
    wc = w_t.astype(compute_dtype)
    h = jnp.dot(xc, w0c, preferred_element_type=jnp.float32) + b0.reshape(1, N)
    for _ in range(n_layers - 1):
        h = jnp.maximum(h, 0.0).astype(compute_dtype)
        h = jnp.dot(h, wc, preferred_element_type=jnp.float32) + b.reshape(1, N)
    return h.reshape(B, S, N)


def reference_forward_f32(x, w0_t, b0, w_t, b, *, n_layers=N_ANN_LAYERS):
    """Full-f32 reference (matches the original PyTorch numerics)."""
    h = jnp.einsum("bsk,kn->bsn", x, w0_t) + b0
    for _ in range(n_layers - 1):
        h = jnp.einsum("bsn,nm->bsm", jnp.maximum(h, 0.0), w_t) + b
    return h


if __name__ == "__main__":
    # Small shapes consistent with the module: a batch of per-frame features.
    B, S = 2, 8
    input_size, reduced_size = 64, 32

    key = jax.random.PRNGKey(0)
    kx, k0w, k0b, kw, kb = jax.random.split(key, 5)

    x = jax.random.normal(kx, (B, S, input_size), dtype=jnp.float32)

    # Deterministic synthetic parameters (stored transposed: (in, out)).
    w0_t = jax.random.normal(k0w, (input_size, reduced_size), jnp.float32) * 0.05
    b0 = jax.random.normal(k0b, (reduced_size,), jnp.float32) * 0.05
    w_t = jax.random.normal(kw, (reduced_size, reduced_size), jnp.float32) * 0.05
    b = jax.random.normal(kb, (reduced_size,), jnp.float32) * 0.05

    out = jax.block_until_ready(ann_forward(x, w0_t, b0, w_t, b))

    ref = reference_forward(x, w0_t, b0, w_t, b)
    ref_f32 = reference_forward_f32(x, w0_t, b0, w_t, b)

    assert out.shape == (B, S, reduced_size)
    assert jnp.allclose(out, ref, atol=1e-4, rtol=1e-4), "mismatch vs bf16 reference"
    assert jnp.allclose(out, ref_f32, atol=3e-2, rtol=3e-2), "mismatch vs f32 reference"

    print("KERNEL_OK")
</pallas_src>

<mosaic_0001>
module attributes {stable_mosaic.version = 11 : i64} {
  func.func @_ann_kernel(%arg0: i32, %arg1: memref<16x64xbf16, #tpu.memory_space<vmem>>, %arg2: memref<64x32xbf16, #tpu.memory_space<vmem>>, %arg3: memref<1x32xf32, #tpu.memory_space<vmem>>, %arg4: memref<32x32xbf16, #tpu.memory_space<vmem>>, %arg5: memref<1x32xf32, #tpu.memory_space<vmem>>, %arg6: memref<16x32xf32, #tpu.memory_space<vmem>>) attributes {dimension_semantics = [#tpu.dimension_semantics<parallel>], iteration_bounds = array<i64: 1>, scalar_prefetch = 0 : i64, scratch_operands = 0 : i64, tpu.core_type = #tpu.core_type<tc>, window_params = [{transform_indices = @transform_0, window_bounds = array<i64: 16, 64>}, {pipeline_mode = #tpu.pipeline_mode<synchronous>, transform_indices = @transform_1, window_bounds = array<i64: 64, 32>}, {pipeline_mode = #tpu.pipeline_mode<synchronous>, transform_indices = @transform_2, window_bounds = array<i64: 1, 32>}, {pipeline_mode = #tpu.pipeline_mode<synchronous>, transform_indices = @transform_3, window_bounds = array<i64: 32, 32>}, {pipeline_mode = #tpu.pipeline_mode<synchronous>, transform_indices = @transform_4, window_bounds = array<i64: 1, 32>}, {transform_indices = @transform_5, window_bounds = array<i64: 16, 32>}]} {
    %c0 = arith.constant 0 : index
    %c0_0 = arith.constant 0 : index
    %0 = vector.load %arg1[%c0, %c0_0] : memref<16x64xbf16, #tpu.memory_space<vmem>>, vector<16x64xbf16>
    %c0_1 = arith.constant 0 : index
    %c0_2 = arith.constant 0 : index
    %1 = vector.load %arg2[%c0_1, %c0_2] : memref<64x32xbf16, #tpu.memory_space<vmem>>, vector<64x32xbf16>
    %cst = arith.constant dense<0.000000e+00> : vector<16x32xf32>
    %2 = tpu.matmul %0, %1, %cst {dimension_numbers = #tpu.dot_dimension_numbers<[1], [0], [0], [1], [0, 0, 1, 1], [], []>} : vector<16x64xbf16>, vector<64x32xbf16>, vector<16x32xf32> -> vector<16x32xf32>
    %c0_3 = arith.constant 0 : index
    %c0_4 = arith.constant 0 : index
    %3 = vector.load %arg3[%c0_3, %c0_4] : memref<1x32xf32, #tpu.memory_space<vmem>>, vector<1x32xf32>
    %4 = vector.broadcast %3 : vector<1x32xf32> to vector<16x32xf32>
    %5 = arith.addf %2, %4 : vector<16x32xf32>
    %cst_5 = arith.constant 0.000000e+00 : f32
    %6 = vector.broadcast %cst_5 : f32 to vector<16x32xf32>
    %7 = arith.maximumf %5, %6 : vector<16x32xf32>
    %8 = arith.truncf %7 : vector<16x32xf32> to vector<16x32xbf16>
    %c0_6 = arith.constant 0 : index
    %c0_7 = arith.constant 0 : index
    %9 = vector.load %arg4[%c0_6, %c0_7] : memref<32x32xbf16, #tpu.memory_space<vmem>>, vector<32x32xbf16>
    %cst_8 = arith.constant dense<0.000000e+00> : vector<16x32xf32>
    %10 = tpu.matmul %8, %9, %cst_8 {dimension_numbers = #tpu.dot_dimension_numbers<[1], [0], [0], [1], [0, 0, 1, 1], [], []>} : vector<16x32xbf16>, vector<32x32xbf16>, vector<16x32xf32> -> vector<16x32xf32>
    %c0_9 = arith.constant 0 : index
    %c0_10 = arith.constant 0 : index
    %11 = vector.load %arg5[%c0_9, %c0_10] : memref<1x32xf32, #tpu.memory_space<vmem>>, vector<1x32xf32>
    %12 = vector.broadcast %11 : vector<1x32xf32> to vector<16x32xf32>
    %13 = arith.addf %10, %12 : vector<16x32xf32>
    %c0_11 = arith.constant 0 : index
    %c0_12 = arith.constant 0 : index
    %14 = vector.load %arg6[%c0_11, %c0_12] : memref<16x32xf32, #tpu.memory_space<vmem>>, vector<16x32xf32>
    tpu.vector_store %arg6[%c0_11, %c0_12], %13 {strides = array<i32>} : memref<16x32xf32, #tpu.memory_space<vmem>>, vector<16x32xf32>,
    return
  }
  func.func @transform_0(%arg0: i32) -> (i32, i32) {
    %c0_i32 = arith.constant 0 : i32
    %c0_i32_0 = arith.constant 0 : i32
    return %arg0, %c0_i32 : i32, i32
  }
  func.func @transform_1(%arg0: i32) -> (i32, i32) {
    %c0_i32 = arith.constant 0 : i32
    %c0_i32_0 = arith.constant 0 : i32
    %c0_i32_1 = arith.constant 0 : i32
    return %c0_i32, %c0_i32_0 : i32, i32
  }
  func.func @transform_2(%arg0: i32) -> (i32, i32) {
    %c0_i32 = arith.constant 0 : i32
    %c0_i32_0 = arith.constant 0 : i32
    %c0_i32_1 = arith.constant 0 : i32
    return %c0_i32, %c0_i32_0 : i32, i32
  }
  func.func @transform_3(%arg0: i32) -> (i32, i32) {
    %c0_i32 = arith.constant 0 : i32
    %c0_i32_0 = arith.constant 0 : i32
    %c0_i32_1 = arith.constant 0 : i32
    return %c0_i32, %c0_i32_0 : i32, i32
  }
  func.func @transform_4(%arg0: i32) -> (i32, i32) {
    %c0_i32 = arith.constant 0 : i32
    %c0_i32_0 = arith.constant 0 : i32
    %c0_i32_1 = arith.constant 0 : i32
    return %c0_i32, %c0_i32_0 : i32, i32
  }
  func.func @transform_5(%arg0: i32) -> (i32, i32) {
    %c0_i32 = arith.constant 0 : i32
    %c0_i32_0 = arith.constant 0 : i32
    return %arg0, %c0_i32 : i32, i32
  }
}

</mosaic_0001>

<bundles_post_ra>
// kernel: tpu_custom_call.1
= control target key start
LH: loop header
LB: loop body
LE: loop exit
PB: predicated region body
PF: predicated region fallthrough
CT: control target
= control target key end

     0   :  { %v275_v1 = vmov 0.0   ;;  %vm276_vm0 = vmmov 0   ;;  %s340_s0 = inlined_call_operand.vmem [shape: bf16[16,64], index: 0, kind: input, shape index: {}]   ;;  %s341_s1 = inlined_call_operand.vmem [shape: bf16[64,32], index: 1, kind: input, shape index: {}]   ;;  %s342_s2 = inlined_call_operand.vmem [shape: f32[1,32], index: 2, kind: input, shape index: {}]   ;;  %s343_s3 = inlined_call_operand.vmem [shape: bf16[32,32], index: 3, kind: input, shape index: {}]   ;;  %s344_s4 = inlined_call_operand.vmem [shape: f32[1,32], index: 4, kind: input, shape index: {}]   ;;  %s345_s5 = inlined_call_operand.hbm [shape: f32[16,32], index: 5, kind: output, shape index: {}]  }
   0x1   :  { %v246_v0 = vld [vmem:[%s341_s1 + $0x18] sm:$0xff]   ;;  %221 = vmatprep.subr.bf16.mxu0 %v275_v1  ;;  %233 = vmatprep.subr.bf16.mxu1 %v275_v1  ;;  %v247_v2 = vld [vmem:[%s341_s1 + $0x10] sm:$0xff]   ;;  %v248_v3 = vld [vmem:[%s341_s1 + $0x8] sm:$0xff]  }
   0x2   :  { %222 = vmatpush3.bf16.msra.mxu0 %v246_v0  ;;  %229 = vmatprep.mubr.msk.bf16.mxu0 %vm276_vm0, %v275_v1 }
   0x3   :  { %223 = vmatprep.subr.bf16.mxu0 %v275_v1  ;;  %237 = vmatprep.mubr.msk.bf16.mxu1 %vm276_vm0, %v275_v1 }
   0x6   :  { %224 = vmatpush3.bf16.msra.mxu0 %v247_v2 }
   0x7   :  { %10 = vsyncpa [#allocation3], 0  ;;  %225 = vmatprep.subr.bf16.mxu0 %v275_v1  ;;  %v249_v4 = vld [vmem:[%s341_s1] sm:$0xff]   ;;  %vm68_vm1 = vcmask 523264   ;;  %v251_v6 = vld [vmem:[%s343_s3 + $0x8] sm:$0xff]   ;;  %vm139_vm2 = vcmask 261120  }
   0x8   :  { %v250_v5 = vld [vmem:[%s340_s0] sm:$0xff]   ;;  %234 = vmatpush3.bf16.msra.mxu1 %v251_v6 }
   0x9   :  { %235 = vmatprep.subr.bf16.mxu1 %v275_v1  ;;  %v252_v7 = vld [vmem:[%s343_s3] sm:$0xff]   ;;  %s277_s3 = smov [#allocation2]  }
   0xa   :  { %226 = vmatpush3.bf16.msra.mxu0 %v248_v3  ;;  %v202_v8 = vld [vmem:[%s342_s2] ss:$0 sm:$0xff]  ;;  %s191_s9 = sshll.u32 %s277_s3, 4  ;;  %s192_s9 = int_to_ptr.vmem [resolvable:$true] %s191_s9 }
   0xb   :  { %227 = vmatprep.subr.bf16.mxu0 %v275_v1  ;;  %v209_v18 = vld [vmem:[%s344_s4] ss:$0 sm:$0xff]  ;;  %s253_s2 = scalar_lea.vmem %s192_s9, 256  ;;  %p258_p1 = scmp.lt.s32.totalorder %s192_s9, %s192_s9 }
   0xc   :  { %236 = vmatpush3.bf16.msra.mxu1 %v252_v7  ;;  %p254_p0 = scmp.ne.s32.totalorder %s192_s9, %s253_s2  ;;  %p259_p2 = scmp.lt.s32.totalorder %s253_s2, %s253_s2 }
   0xe   :  { %228 = vmatpush3.bf16.msra.mxu0 %v249_v4  ;;  %p260_p3 = por %p259_p2, %p258_p1 }
  0x10   :  { %p261_p4 = pnand %p260_p3, %p254_p0 }
  0x11   :  { %230 = vmatmul.mubr.msk.bf16.vlgmr.msra.gmra.mxu0 %vm68_vm1, %v250_v5 }
  0xd1   :  { %v106_v9 = vpop.f32.mrf.mxu0 }
  0xd2   :  { %v107_v11 = vadd.f32 %v202_v8, %v106_v9 }
  0xd3   :  { %v231_v10 = vpop.f32.mrf.mxu0 }
  0xd4   :  { %v113_v15 = vmax.f32 %v107_v11, 0.0 }
  0xd5   :  { %v109_v12 = vpop.f32.mrf.mxu0 }
  0xd6   :  { %v110_v13 = vadd.f32 %v202_v8, %v109_v12 }
  0xd7   :  { %v232_v14 = vpop.f32.mrf.mxu0 }
  0xd8   :  { %v114_v16 = vmax.f32 %v110_v13, 0.0 }
  0xda   :  { %v115_v17 = vpack.c.bf16 %v114_v16, %v113_v15 }
  0xdc   :  { %238 = vmatmul.mubr.msk.bf16.vlgmr.msra.gmra.mxu1 %vm139_vm2, %v115_v17 }
 0x19c   :  { %v177_v19 = vpop.f32.mrf.mxu1 }
 0x19d   :  { %v178_v20 = vadd.f32 %v209_v18, %v177_v19 }
 0x19e   :  { %v239_v21 = vpop.f32.mrf.mxu1 }
 0x19f   :  { %184 = vst.msk [vmem:[#allocation2] sm:$0xff] %vm139_vm2, %v178_v20 }
 0x1a0   :  { %v180_v22 = vpop.f32.mrf.mxu1 }
 0x1a1   :  { %v181_v23 = vadd.f32 %v209_v18, %v180_v22 }
 0x1a2   :  { %v240_v24 = vpop.f32.mrf.mxu1 }
 0x1a3   :  { %185 = vst.msk [vmem:[#allocation2 + $0x8] sm:$0xff] %vm139_vm2, %v181_v23 }
 0x1a4   :  { %264 = shalt.err (!%p261_p4)
}
 0x1a5   :  { %s278_s10 = smov 128   ;;  %s279_s4 = smov 8  }
 0x1a6   :  { %197 = dma.vmem_to_hbm [thread:$0]  %s192_s9, 256, %s345_s5, [#allocation3], %s278_s10, %s278_s10, %s279_s4  }
 0x1a7   :  { %273 = dma.done.wait [#allocation3], 256  }
 0x1a8   :  { %274 = vsyncadd [#allocation3], 4294967040 }
 0x1a9   :  { %201 = vsyncpa [#allocation3], 1 }

</bundles_post_ra>
